<compile_context>
chip_gen: v6e
topology: v6e:2x2x1
jax: 0.10.0
libtpu: 0.0.40
codegen_flags: <defaults>
</compile_context>

<pallas_src>
import math
from functools import partial

import jax
import jax.numpy as jnp
from jax.experimental import pallas as pl
from jax.experimental.pallas import tpu as pltpu


def _round_up(n, m):
    return (n + m - 1) // m * m


# ----------------------------------------------------------------------------
# helpers (VPU + approx-EUP only)
# ----------------------------------------------------------------------------
def _atan_f32(x):
    """float32 arctan (Cephes-style); divides replaced by approx reciprocals."""
    sign = jnp.where(x < 0.0, -1.0, 1.0).astype(jnp.float32)
    t = jnp.abs(x)
    big = t > 2.414213562373095      # tan(3*pi/8)
    mid = t > 0.4142135623730951     # tan(pi/8)
    x_big = -pl.reciprocal(t + 1e-30, approx=True)
    x_mid = (t - 1.0) * pl.reciprocal(t + 1.0, approx=True)
    xr = jnp.where(big, x_big, jnp.where(mid, x_mid, t))
    base = jnp.where(big, jnp.float32(math.pi / 2.0),
                     jnp.where(mid, jnp.float32(math.pi / 4.0), jnp.float32(0.0)))
    z = xr * xr
    poly = ((((8.05374449538e-2 * z - 1.38776856032e-1) * z
              + 1.99777106478e-1) * z - 3.33329491539e-1) * z * xr) + xr
    return sign * (base + poly)


# ----------------------------------------------------------------------------
# fused kernel: one grid step == one chunk of TB batch elements (lane-packed)
# ----------------------------------------------------------------------------
def _freq_rec_kernel(x_ref, dft3_ref, wemb_ref, posri_ref, wamp_ref, wph_ref,
                     bap_ref, idftc_ref, idfts_ref, wout_ref, bout_ref,
                     out_ref, *, Fp):
    f32 = jnp.float32
    cdt = dft3_ref.dtype                      # MXU operand dtype (bf16 or f32)
    two_fp = 2 * Fp

    x = x_ref[...]                                                    # (L, TB*D) in cdt

    # --- circular k=3 token conv + positional emb + rfft, re-associated -------
    # dft3 stacks the three column-rolled [cos;sin] DFT copies (sublane-stacked).
    y = jnp.dot(dft3_ref[...], x, preferred_element_type=f32)         # (6Fp, TB*D)
    # lane-stack the three tap results -> ONE embedding matmul with K = 3*TB*D
    y_cat = jnp.concatenate([y[:two_fp].astype(cdt),
                             y[two_fp:2 * two_fp].astype(cdt),
                             y[2 * two_fp:].astype(cdt)], axis=1)      # (2Fp, 3*TB*D)
    ri = (jnp.dot(y_cat, wemb_ref[...], preferred_element_type=f32)
          + posri_ref[...])                                            # (2Fp, TB*M)

    real = ri[:Fp]                                                     # (Fp, TB*M)
    imag = ri[Fp:]

    # amp = MSELoss(real, imag, 'none');  phase = arctan(imag / (real + 1e-5))
    diff = real - imag
    amp = diff * diff
    phase = _atan_f32(imag * pl.reciprocal(real + 1e-5, approx=True))

    # amp_linear / phase_linear along the (padded) frequency axis
    bap = bap_ref[...]                                                 # (2Fp, 1)
    amp_c = (jnp.dot(wamp_ref[...], amp.astype(cdt),
                     preferred_element_type=f32) + bap[:Fp])
    ph_c = (jnp.dot(wph_ref[...], phase.astype(cdt),
                    preferred_element_type=f32) + bap[Fp:])

    # frequency_new = amp_c * exp(i*phase_c); irfft as two accumulating matmuls
    re_new = (amp_c * jnp.cos(ph_c)).astype(cdt)
    im_new = (amp_c * jnp.sin(ph_c)).astype(cdt)
    rec = (jnp.dot(idftc_ref[...], re_new, preferred_element_type=f32)
           + jnp.dot(idfts_ref[...], im_new, preferred_element_type=f32))  # (L, TB*M)

    # projection_out: Linear(d_model -> dim), block-diagonal over the packed batch
    out = (jnp.dot(rec.astype(cdt), wout_ref[...], preferred_element_type=f32)
           + bout_ref[...])                                            # (L, TB*D)
    out_ref[...] = out.astype(out_ref.dtype)


# ----------------------------------------------------------------------------
# plain-JAX glue: constants, parameter re-packing, tiling heuristics
# ----------------------------------------------------------------------------
def sinusoidal_pos_emb(L, d_model):
    pos = jnp.arange(L, dtype=jnp.float32)[:, None]
    idx = jnp.arange(0, d_model, 2, dtype=jnp.float32)
    div = jnp.exp(idx * (-math.log(10000.0) / d_model))
    pe = jnp.zeros((L, d_model), jnp.float32)
    pe = pe.at[:, 0::2].set(jnp.sin(pos * div))
    pe = pe.at[:, 1::2].set(jnp.cos(pos * div))
    return pe


def _padded_dft_matrices(L, Fp):
    """[cos; -sin] rfft matrix and split cos/sin irfft matrices, freq-padded to Fp."""
    F = L // 2 + 1
    l = jnp.arange(L, dtype=jnp.float32)
    f = jnp.arange(F, dtype=jnp.float32)
    ang = 2.0 * math.pi * f[:, None] * l[None, :] / L                  # (F, L)
    zrow = jnp.zeros((Fp - F, L), jnp.float32)
    dft_ri = jnp.concatenate([jnp.cos(ang), zrow, -jnp.sin(ang), zrow], axis=0)  # (2Fp, L)
    # irfft (c2r, norm="backward"): weight 1 on DC/Nyquist, 2 elsewhere, divide by L
    w = jnp.ones((F,), jnp.float32).at[1:F - 1].set(2.0)
    ang2 = 2.0 * math.pi * l[:, None] * f[None, :] / L                 # (L, F)
    zcol = jnp.zeros((L, Fp - F), jnp.float32)
    idft_cos = jnp.concatenate([(w[None, :] * jnp.cos(ang2)) / L, zcol], axis=1)   # (L, Fp)
    idft_sin = jnp.concatenate([(-(w[None, :]) * jnp.sin(ang2)) / L, zcol], axis=1)  # (L, Fp)
    return dft_ri, idft_cos, idft_sin


def _tpu_vmem_bytes():
    """Physical VMEM of the local chip; conservative fallback (v7x per-TC) otherwise."""
    try:
        if hasattr(pltpu, "get_tpu_info"):
            v = int(pltpu.get_tpu_info().vmem_capacity_bytes)
            if v > 0:
                return v
    except Exception:
        pass
    return 64 * 1024 * 1024


def _is_multi_tensorcore_chip():
    """Chips whose TensorCores share a ('parallel',) grid axis (want >= 2 steps)."""
    try:
        kind = jax.devices()[0].device_kind.lower()
    except Exception:
        return False
    return ("v7" in kind) or ("7x" in kind) or ("v4" in kind) or ("v5p" in kind)


def _vmem_estimate(tb, L, D, M, Fp, bpe):
    """Conservative per-step VMEM estimate (assumes default double-buffering)."""
    f32 = 4
    io = 2 * 2 * L * tb * D * f32                          # x + out blocks, 2 buffers each
    consts = (6 * Fp * L * bpe                             # dft3
              + 3 * tb * D * tb * M * bpe                  # merged kron embedding weight
              + 2 * Fp * tb * M * f32                      # rfft(pos) constant
              + 2 * Fp * Fp * bpe                          # W_amp + W_phase
              + 2 * L * Fp * bpe                           # idft cos + sin halves
              + tb * M * tb * D * bpe                      # W_out kron
              + 2 * Fp * f32 + tb * D * f32)               # biases
    consts *= 2                                            # double-buffered by default
    inter = (6 * Fp * tb * D * f32 + 2 * Fp * 3 * tb * D * bpe
             + 2 * Fp * tb * M * f32 + 6 * Fp * tb * M * f32
             + L * tb * M * f32 + L * tb * D * f32)
    return io + consts + int(1.5 * inter)


def _pick_tb(B, L, D, M, Fp, bpe, vmem_budget, want_two_steps):
    """Batch-chunk size folded onto the lane axis.

    Priorities (per perf review): (1) I/O lane width TB*D >= 128 (lane-dense
    x / out blocks, unmasked stores), (2) amortize the ~0.35 us per-grid-step
    overhead, (3) keep the TB^2 kron weights / FLOP waste inside the VMEM
    budget, (4) on multi-TC chips keep >= 2 grid steps only if that does not
    break the 128-lane floor, (5) minimize batch padding at constant G.
    """
    lane_floor = -(-128 // max(D, 1))                      # ceil(128 / D)
    tb = max(lane_floor, 4)                                # 4 = grid-overhead floor
    tb = max(1, min(tb, B))
    while tb > 1 and _vmem_estimate(tb, L, D, M, Fp, bpe) > vmem_budget:
        tb -= 1
    if want_two_steps and tb >= B and B > 1:
        half = -(-B // 2)
        if half * D >= 128 or tb * D < 128:
            tb = half
    G = -(-B // tb)
    tb_min_same_g = -(-B // G)                             # less padding, same G
    if tb_min_same_g < tb and (tb_min_same_g * D >= 128 or tb * D < 128):
        tb = tb_min_same_g
        G = -(-B // tb)
    return tb, G


@partial(jax.jit, static_argnames=("matmul_dtype",))
def frequence_reconstructor(x, W_emb, W_amp, b_amp, W_phase, b_phase, W_out, b_out,
                            *, matmul_dtype=jnp.bfloat16):
    B, L, D = x.shape
    M = W_emb.shape[1]
    F = L // 2 + 1
    assert L % 2 == 0, "use an even win_size (irfft output length = 2*(F-1))"
    Fp = _round_up(F, 8)                       # sublane-aligned frequency padding

    cdt = jnp.dtype(matmul_dtype)              # MXU operand dtype (bf16 default)
    bpe = cdt.itemsize

    phys_vmem = _tpu_vmem_bytes()
    vmem_limit = max(32 * 2 ** 20, min(int(phys_vmem * 0.85), 128 * 2 ** 20))
    TB, G = _pick_tb(B, L, D, M, Fp, bpe, vmem_budget=vmem_limit // 2,
                     want_two_steps=_is_multi_tensorcore_chip())
    Bp = G * TB

    # ---- constants / parameter re-packing (traced once under jit) -------------
    dft_ri, idft_cos, idft_sin = _padded_dft_matrices(L, Fp)
    # circular k=3 conv taps x[l-1], x[l], x[l+1] folded into column-rolled DFTs
    dft3 = jnp.concatenate([jnp.roll(dft_ri, -1, axis=1),    # pairs with tap x[l-1]
                            dft_ri,                          # pairs with tap x[l]
                            jnp.roll(dft_ri, 1, axis=1)],    # pairs with tap x[l+1]
                           axis=0).astype(cdt)               # (6Fp, L)
    # positional embedding pre-transformed into the frequency domain (kept f32)
    pos_ri = jnp.dot(dft_ri, sinusoidal_pos_emb(L, M),
                     precision=jax.lax.Precision.HIGHEST)    # (2Fp, M)
    pos_ri_t = jnp.tile(pos_ri, (1, TB))                     # (2Fp, TB*M)

    eye_tb = jnp.eye(TB, dtype=jnp.float32)
    # merged tap weight: rows ordered (tap, tb, d), block-diagonal over the batch
    w_emb_stack = jnp.concatenate(
        [jnp.kron(eye_tb, W_emb[k * D:(k + 1) * D]) for k in range(3)],
        axis=0).astype(cdt)                                  # (3*TB*D, TB*M)
    w_out_blk = jnp.kron(eye_tb, W_out).astype(cdt)          # (TB*M, TB*D)
    b_out_t = jnp.tile(b_out, TB)[None, :].astype(jnp.float32)   # (1, TB*D)

    w_amp_p = jnp.zeros((Fp, Fp), jnp.float32).at[:F, :F].set(W_amp).astype(cdt)
    w_ph_p = jnp.zeros((Fp, Fp), jnp.float32).at[:F, :F].set(W_phase).astype(cdt)
    b_ap = (jnp.zeros((2 * Fp, 1), jnp.float32)
            .at[:F, 0].set(b_amp).at[Fp:Fp + F, 0].set(b_phase))

    # ---- batch folded onto the lane axis: (G, L, TB*D) lane-dense chunks -------
    x_pad = jnp.zeros((Bp, L, D), jnp.float32).at[:B].set(x)
    x_t = (x_pad.reshape(G, TB, L, D).transpose(0, 2, 1, 3)
           .reshape(G, L, TB * D).astype(cdt))

    # NOTE: grid-invariant inputs below could be single-buffered via
    # pipeline_mode=pl.Buffered(1) for extra VMEM headroom; the TB budget above
    # conservatively assumes default double-buffering instead.
    kernel = pl.pallas_call(
        partial(_freq_rec_kernel, Fp=Fp),
        out_shape=jax.ShapeDtypeStruct((G, L, TB * D), jnp.float32),
        grid_spec=pltpu.PrefetchScalarGridSpec(
            num_scalar_prefetch=0,
            grid=(G,),
            in_specs=[
                pl.BlockSpec((None, L, TB * D),     lambda g: (g, 0, 0)),  # x chunk
                pl.BlockSpec((6 * Fp, L),           lambda g: (0, 0)),     # rolled DFT stack
                pl.BlockSpec((3 * TB * D, TB * M),  lambda g: (0, 0)),     # merged conv taps
                pl.BlockSpec((2 * Fp, TB * M),      lambda g: (0, 0)),     # rfft(pos) constant
                pl.BlockSpec((Fp, Fp),              lambda g: (0, 0)),     # W_amp (padded)
                pl.BlockSpec((Fp, Fp),              lambda g: (0, 0)),     # W_phase (padded)
                pl.BlockSpec((2 * Fp, 1),           lambda g: (0, 0)),     # [b_amp; b_phase]
                pl.BlockSpec((L, Fp),               lambda g: (0, 0)),     # idft cos half
                pl.BlockSpec((L, Fp),               lambda g: (0, 0)),     # idft sin half
                pl.BlockSpec((TB * M, TB * D),      lambda g: (0, 0)),     # W_out (blockdiag)
                pl.BlockSpec((1, TB * D),           lambda g: (0, 0)),     # b_out tiled
            ],
            out_specs=pl.BlockSpec((None, L, TB * D), lambda g: (g, 0, 0)),
        ),
        compiler_params=pltpu.CompilerParams(
            dimension_semantics=("parallel",),
            vmem_limit_bytes=int(vmem_limit)),
    )
    out = kernel(x_t, dft3, w_emb_stack, pos_ri_t, w_amp_p, w_ph_p, b_ap,
                 idft_cos.astype(cdt), idft_sin.astype(cdt), w_out_blk, b_out_t)

    # undo the lane packing: (G, L, TB*D) -> (B, L, D)   (layout plumbing only)
    out = out.reshape(G, L, TB, D).transpose(0, 2, 1, 3).reshape(Bp, L, D)
    return out[:B]


# ----------------------------------------------------------------------------
# parameters + pure-JAX reference (jnp.fft / jnp.arctan) for correctness check
# ----------------------------------------------------------------------------
def make_params(key, win_size, dim, d_model):
    F = win_size // 2 + 1
    ks = jax.random.split(key, 7)

    def unif(k, shape, bound):
        return jax.random.uniform(k, shape, jnp.float32, -bound, bound)

    return {
        # TokenEmbedding conv weight, flattened: row (k*dim + d), col m <-> W_conv[m, d, k]
        "W_emb":   unif(ks[0], (3 * dim, d_model), 1.0 / math.sqrt(3 * dim)),
        "W_amp":   unif(ks[1], (F, F), 1.0 / math.sqrt(F)),
        "b_amp":   unif(ks[2], (F,), 1.0 / math.sqrt(F)),
        "W_phase": unif(ks[3], (F, F), 1.0 / math.sqrt(F)),
        "b_phase": unif(ks[4], (F,), 1.0 / math.sqrt(F)),
        "W_out":   unif(ks[5], (d_model, dim), 1.0 / math.sqrt(d_model)),  # (M, D)
        "b_out":   unif(ks[6], (dim,), 1.0 / math.sqrt(d_model)),
    }


def reference(x, W_emb, pos, W_amp, b_amp, W_phase, b_phase, W_out, b_out):
    B, L, D = x.shape
    hi = jax.lax.Precision.HIGHEST
    x_cat = jnp.concatenate([jnp.roll(x, 1, axis=1), x, jnp.roll(x, -1, axis=1)], axis=-1)
    emb = jnp.einsum('blk,km->blm', x_cat, W_emb, precision=hi) + pos[None]
    fc = jnp.fft.rfft(emb, axis=1)
    real, imag = jnp.real(fc), jnp.imag(fc)
    amp = (real - imag) ** 2
    phase = jnp.arctan(imag / (real + 1e-05))
    amp_c = jnp.einsum('bfm,gf->bgm', amp, W_amp, precision=hi) + b_amp[None, :, None]
    phase_c = jnp.einsum('bfm,gf->bgm', phase, W_phase, precision=hi) + b_phase[None, :, None]
    freq_new = (amp_c * jnp.cos(phase_c)) + 1j * (amp_c * jnp.sin(phase_c))
    rec = jnp.fft.irfft(freq_new, n=L, axis=1)
    return jnp.einsum('blm,md->bld', rec, W_out, precision=hi) + b_out[None, None, :]


if __name__ == "__main__":
    B, win_size, dim, d_model = 2, 16, 4, 32   # step_size / unused submodules omitted

    key = jax.random.PRNGKey(0)
    kx, kp = jax.random.split(key)
    x = jax.random.normal(kx, (B, win_size, dim), jnp.float32)
    p = make_params(kp, win_size, dim, d_model)
    args = (x, p["W_emb"], p["W_amp"], p["b_amp"], p["W_phase"], p["b_phase"],
            p["W_out"], p["b_out"])
    ref = reference(x, p["W_emb"], sinusoidal_pos_emb(win_size, d_model),
                    p["W_amp"], p["b_amp"], p["W_phase"], p["b_phase"],
                    p["W_out"], p["b_out"])

    # production path: bf16 MXU operands (default)
    out_bf16 = jax.block_until_ready(frequence_reconstructor(*args))
    assert out_bf16.shape == (B, win_size, dim)
    # loose sanity only: arctan(imag/(real+1e-5)) has a branch point at
    # real == -1e-5 where reduced-precision matmuls can legitimately flip the
    # branch, so the bf16 path is not bit-comparable against the f32 reference.
    assert bool(jnp.all(jnp.isfinite(out_bf16)))

    # verification path: f32 MXU operands, checked tightly against jnp.fft reference
    out_f32 = jax.block_until_ready(
        frequence_reconstructor(*args, matmul_dtype=jnp.float32))
    assert out_f32.shape == (B, win_size, dim)
    rel_err = float(jnp.max(jnp.abs(out_f32 - ref)) / (jnp.max(jnp.abs(ref)) + 1e-6))
    assert rel_err < 5e-3, f"kernel/reference mismatch: rel-max err {rel_err}"

    print("KERNEL_OK")
</pallas_src>

<mosaic_0001>
module attributes {stable_mosaic.version = 11 : i64} {
  func.func @_freq_rec_kernel(%arg0: i32, %arg1: memref<1x16x8xbf16, #tpu.memory_space<vmem>>, %arg2: memref<96x16xbf16, #tpu.memory_space<vmem>>, %arg3: memref<24x64xbf16, #tpu.memory_space<vmem>>, %arg4: memref<32x64xf32, #tpu.memory_space<vmem>>, %arg5: memref<16x16xbf16, #tpu.memory_space<vmem>>, %arg6: memref<16x16xbf16, #tpu.memory_space<vmem>>, %arg7: memref<32x1xf32, #tpu.memory_space<vmem>>, %arg8: memref<16x16xbf16, #tpu.memory_space<vmem>>, %arg9: memref<16x16xbf16, #tpu.memory_space<vmem>>, %arg10: memref<64x8xbf16, #tpu.memory_space<vmem>>, %arg11: memref<1x8xf32, #tpu.memory_space<vmem>>, %arg12: memref<1x16x8xf32, #tpu.memory_space<vmem>>) attributes {dimension_semantics = [#tpu.dimension_semantics<parallel>], iteration_bounds = array<i64: 1>, scalar_prefetch = 0 : i64, scratch_operands = 0 : i64, tpu.core_type = #tpu.core_type<tc>, window_params = [{transform_indices = @transform_0, window_bounds = array<i64: 1, 16, 8>}, {pipeline_mode = #tpu.pipeline_mode<synchronous>, transform_indices = @transform_1, window_bounds = array<i64: 96, 16>}, {pipeline_mode = #tpu.pipeline_mode<synchronous>, transform_indices = @transform_2, window_bounds = array<i64: 24, 64>}, {pipeline_mode = #tpu.pipeline_mode<synchronous>, transform_indices = @transform_3, window_bounds = array<i64: 32, 64>}, {pipeline_mode = #tpu.pipeline_mode<synchronous>, transform_indices = @transform_4, window_bounds = array<i64: 16, 16>}, {pipeline_mode = #tpu.pipeline_mode<synchronous>, transform_indices = @transform_5, window_bounds = array<i64: 16, 16>}, {pipeline_mode = #tpu.pipeline_mode<synchronous>, transform_indices = @transform_6, window_bounds = array<i64: 32, 1>}, {pipeline_mode = #tpu.pipeline_mode<synchronous>, transform_indices = @transform_7, window_bounds = array<i64: 16, 16>}, {pipeline_mode = #tpu.pipeline_mode<synchronous>, transform_indices = @transform_8, window_bounds = array<i64: 16, 16>}, {pipeline_mode = #tpu.pipeline_mode<synchronous>, transform_indices = @transform_9, window_bounds = array<i64: 64, 8>}, {pipeline_mode = #tpu.pipeline_mode<synchronous>, transform_indices = @transform_10, window_bounds = array<i64: 1, 8>}, {transform_indices = @transform_11, window_bounds = array<i64: 1, 16, 8>}]} {
    %c0 = arith.constant 0 : index
    %c0_0 = arith.constant 0 : index
    %c0_1 = arith.constant 0 : index
    %0 = vector.load %arg1[%c0, %c0_0, %c0_1] : memref<1x16x8xbf16, #tpu.memory_space<vmem>>, vector<1x16x8xbf16>
    %1 = vector.shape_cast %0 : vector<1x16x8xbf16> to vector<16x8xbf16>
    %c0_2 = arith.constant 0 : index
    %c0_3 = arith.constant 0 : index
    %2 = vector.load %arg2[%c0_2, %c0_3] : memref<96x16xbf16, #tpu.memory_space<vmem>>, vector<96x16xbf16>
    %cst = arith.constant dense<0.000000e+00> : vector<96x8xf32>
    %3 = tpu.matmul %2, %1, %cst {dimension_numbers = #tpu.dot_dimension_numbers<[1], [0], [0], [1], [0, 0, 1, 1], [], []>} : vector<96x16xbf16>, vector<16x8xbf16>, vector<96x8xf32> -> vector<96x8xf32>
    %4 = vector.extract_strided_slice %3 {offsets = [0, 0], sizes = [32, 8], strides = [1, 1]} : vector<96x8xf32> to vector<32x8xf32>
    %5 = arith.truncf %4 : vector<32x8xf32> to vector<32x8xbf16>
    %6 = vector.extract_strided_slice %3 {offsets = [32, 0], sizes = [32, 8], strides = [1, 1]} : vector<96x8xf32> to vector<32x8xf32>
    %7 = arith.truncf %6 : vector<32x8xf32> to vector<32x8xbf16>
    %8 = vector.extract_strided_slice %3 {offsets = [64, 0], sizes = [32, 8], strides = [1, 1]} : vector<96x8xf32> to vector<32x8xf32>
    %9 = arith.truncf %8 : vector<32x8xf32> to vector<32x8xbf16>
    %10 = tpu.concatenate %5, %7, %9 in 1 : vector<32x8xbf16>, vector<32x8xbf16>, vector<32x8xbf16> -> vector<32x24xbf16>
    %c0_4 = arith.constant 0 : index
    %c0_5 = arith.constant 0 : index
    %11 = vector.load %arg3[%c0_4, %c0_5] : memref<24x64xbf16, #tpu.memory_space<vmem>>, vector<24x64xbf16>
    %cst_6 = arith.constant dense<0.000000e+00> : vector<32x64xf32>
    %12 = tpu.matmul %10, %11, %cst_6 {dimension_numbers = #tpu.dot_dimension_numbers<[1], [0], [0], [1], [0, 0, 1, 1], [], []>} : vector<32x24xbf16>, vector<24x64xbf16>, vector<32x64xf32> -> vector<32x64xf32>
    %c0_7 = arith.constant 0 : index
    %c0_8 = arith.constant 0 : index
    %13 = vector.load %arg4[%c0_7, %c0_8] : memref<32x64xf32, #tpu.memory_space<vmem>>, vector<32x64xf32>
    %14 = arith.addf %12, %13 : vector<32x64xf32>
    %15 = vector.extract_strided_slice %14 {offsets = [0, 0], sizes = [16, 64], strides = [1, 1]} : vector<32x64xf32> to vector<16x64xf32>
    %16 = vector.extract_strided_slice %14 {offsets = [16, 0], sizes = [16, 64], strides = [1, 1]} : vector<32x64xf32> to vector<16x64xf32>
    %17 = arith.subf %15, %16 : vector<16x64xf32>
    %18 = arith.mulf %17, %17 : vector<16x64xf32>
    %cst_9 = arith.constant 9.99999974E-6 : f32
    %19 = vector.broadcast %cst_9 : f32 to vector<16x64xf32>
    %20 = arith.addf %15, %19 : vector<16x64xf32>
    %21 = tpu.reciprocal %20 {approx = true} : vector<16x64xf32> -> vector<16x64xf32>
    %22 = arith.mulf %16, %21 : vector<16x64xf32>
    %cst_10 = arith.constant 0.000000e+00 : f32
    %23 = vector.broadcast %cst_10 : f32 to vector<16x64xf32>
    %24 = arith.cmpf olt, %22, %23 : vector<16x64xf32>
    %cst_11 = arith.constant -1.000000e+00 : f32
    %cst_12 = arith.constant 1.000000e+00 : f32
    %25 = vector.broadcast %cst_11 : f32 to vector<16x64xf32>
    %26 = vector.broadcast %cst_12 : f32 to vector<16x64xf32>
    %27 = arith.select %24, %25, %26 : vector<16x64xi1>, vector<16x64xf32>
    %28 = math.absf %22 : vector<16x64xf32>
    %cst_13 = arith.constant 2.41421366 : f32
    %29 = vector.broadcast %cst_13 : f32 to vector<16x64xf32>
    %30 = arith.cmpf ogt, %28, %29 : vector<16x64xf32>
    %cst_14 = arith.constant 0.414213568 : f32
    %31 = vector.broadcast %cst_14 : f32 to vector<16x64xf32>
    %32 = arith.cmpf ogt, %28, %31 : vector<16x64xf32>
    %cst_15 = arith.constant 1.000000e-30 : f32
    %33 = vector.broadcast %cst_15 : f32 to vector<16x64xf32>
    %34 = arith.addf %28, %33 : vector<16x64xf32>
    %35 = tpu.reciprocal %34 {approx = true} : vector<16x64xf32> -> vector<16x64xf32>
    %cst_16 = arith.constant 0.000000e+00 : f32
    %36 = vector.broadcast %cst_16 : f32 to vector<16x64xf32>
    %37 = arith.subf %36, %35 : vector<16x64xf32>
    %cst_17 = arith.constant 1.000000e+00 : f32
    %38 = vector.broadcast %cst_17 : f32 to vector<16x64xf32>
    %39 = arith.subf %28, %38 : vector<16x64xf32>
    %cst_18 = arith.constant 1.000000e+00 : f32
    %40 = vector.broadcast %cst_18 : f32 to vector<16x64xf32>
    %41 = arith.addf %28, %40 : vector<16x64xf32>
    %42 = tpu.reciprocal %41 {approx = true} : vector<16x64xf32> -> vector<16x64xf32>
    %43 = arith.mulf %39, %42 : vector<16x64xf32>
    %44 = arith.select %32, %43, %28 : vector<16x64xi1>, vector<16x64xf32>
    %45 = arith.select %30, %37, %44 : vector<16x64xi1>, vector<16x64xf32>
    %cst_19 = arith.constant 0.785398185 : f32
    %cst_20 = arith.constant 0.000000e+00 : f32
    %46 = vector.broadcast %cst_19 : f32 to vector<16x64xf32>
    %47 = vector.broadcast %cst_20 : f32 to vector<16x64xf32>
    %48 = arith.select %32, %46, %47 : vector<16x64xi1>, vector<16x64xf32>
    %cst_21 = arith.constant 1.57079637 : f32
    %49 = vector.broadcast %cst_21 : f32 to vector<16x64xf32>
    %50 = arith.select %30, %49, %48 : vector<16x64xi1>, vector<16x64xf32>
    %51 = arith.mulf %45, %45 : vector<16x64xf32>
    %cst_22 = arith.constant 0.0805374458 : f32
    %52 = vector.broadcast %cst_22 : f32 to vector<16x64xf32>
    %53 = arith.mulf %52, %51 : vector<16x64xf32>
    %cst_23 = arith.constant 0.138776854 : f32
    %54 = vector.broadcast %cst_23 : f32 to vector<16x64xf32>
    %55 = arith.subf %53, %54 : vector<16x64xf32>
    %56 = arith.mulf %55, %51 : vector<16x64xf32>
    %cst_24 = arith.constant 0.199777111 : f32
    %57 = vector.broadcast %cst_24 : f32 to vector<16x64xf32>
    %58 = arith.addf %56, %57 : vector<16x64xf32>
    %59 = arith.mulf %58, %51 : vector<16x64xf32>
    %cst_25 = arith.constant 0.333329499 : f32
    %60 = vector.broadcast %cst_25 : f32 to vector<16x64xf32>
    %61 = arith.subf %59, %60 : vector<16x64xf32>
    %62 = arith.mulf %61, %51 : vector<16x64xf32>
    %63 = arith.mulf %62, %45 : vector<16x64xf32>
    %64 = arith.addf %63, %45 : vector<16x64xf32>
    %65 = arith.addf %50, %64 : vector<16x64xf32>
    %66 = arith.mulf %27, %65 : vector<16x64xf32>
    %c0_26 = arith.constant 0 : index
    %c0_27 = arith.constant 0 : index
    %67 = vector.load %arg7[%c0_26, %c0_27] : memref<32x1xf32, #tpu.memory_space<vmem>>, vector<32x1xf32>
    %c0_28 = arith.constant 0 : index
    %c0_29 = arith.constant 0 : index
    %68 = vector.load %arg5[%c0_28, %c0_29] : memref<16x16xbf16, #tpu.memory_space<vmem>>, vector<16x16xbf16>
    %69 = arith.truncf %18 : vector<16x64xf32> to vector<16x64xbf16>
    %cst_30 = arith.constant dense<0.000000e+00> : vector<16x64xf32>
    %70 = tpu.matmul %68, %69, %cst_30 {dimension_numbers = #tpu.dot_dimension_numbers<[1], [0], [0], [1], [0, 0, 1, 1], [], []>} : vector<16x16xbf16>, vector<16x64xbf16>, vector<16x64xf32> -> vector<16x64xf32>
    %71 = vector.extract_strided_slice %67 {offsets = [0, 0], sizes = [16, 1], strides = [1, 1]} : vector<32x1xf32> to vector<16x1xf32>
    %72 = vector.broadcast %71 : vector<16x1xf32> to vector<16x64xf32>
    %73 = arith.addf %70, %72 : vector<16x64xf32>
    %c0_31 = arith.constant 0 : index
    %c0_32 = arith.constant 0 : index
    %74 = vector.load %arg6[%c0_31, %c0_32] : memref<16x16xbf16, #tpu.memory_space<vmem>>, vector<16x16xbf16>
    %75 = arith.truncf %66 : vector<16x64xf32> to vector<16x64xbf16>
    %cst_33 = arith.constant dense<0.000000e+00> : vector<16x64xf32>
    %76 = tpu.matmul %74, %75, %cst_33 {dimension_numbers = #tpu.dot_dimension_numbers<[1], [0], [0], [1], [0, 0, 1, 1], [], []>} : vector<16x16xbf16>, vector<16x64xbf16>, vector<16x64xf32> -> vector<16x64xf32>
    %77 = vector.extract_strided_slice %67 {offsets = [16, 0], sizes = [16, 1], strides = [1, 1]} : vector<32x1xf32> to vector<16x1xf32>
    %78 = vector.broadcast %77 : vector<16x1xf32> to vector<16x64xf32>
    %79 = arith.addf %76, %78 : vector<16x64xf32>
    %80 = math.cos %79 : vector<16x64xf32>
    %81 = arith.mulf %73, %80 : vector<16x64xf32>
    %82 = arith.truncf %81 : vector<16x64xf32> to vector<16x64xbf16>
    %83 = math.sin %79 : vector<16x64xf32>
    %84 = arith.mulf %73, %83 : vector<16x64xf32>
    %85 = arith.truncf %84 : vector<16x64xf32> to vector<16x64xbf16>
    %c0_34 = arith.constant 0 : index
    %c0_35 = arith.constant 0 : index
    %86 = vector.load %arg8[%c0_34, %c0_35] : memref<16x16xbf16, #tpu.memory_space<vmem>>, vector<16x16xbf16>
    %cst_36 = arith.constant dense<0.000000e+00> : vector<16x64xf32>
    %87 = tpu.matmul %86, %82, %cst_36 {dimension_numbers = #tpu.dot_dimension_numbers<[1], [0], [0], [1], [0, 0, 1, 1], [], []>} : vector<16x16xbf16>, vector<16x64xbf16>, vector<16x64xf32> -> vector<16x64xf32>
    %c0_37 = arith.constant 0 : index
    %c0_38 = arith.constant 0 : index
    %88 = vector.load %arg9[%c0_37, %c0_38] : memref<16x16xbf16, #tpu.memory_space<vmem>>, vector<16x16xbf16>
    %cst_39 = arith.constant dense<0.000000e+00> : vector<16x64xf32>
    %89 = tpu.matmul %88, %85, %cst_39 {dimension_numbers = #tpu.dot_dimension_numbers<[1], [0], [0], [1], [0, 0, 1, 1], [], []>} : vector<16x16xbf16>, vector<16x64xbf16>, vector<16x64xf32> -> vector<16x64xf32>
    %90 = arith.addf %87, %89 : vector<16x64xf32>
    %91 = arith.truncf %90 : vector<16x64xf32> to vector<16x64xbf16>
    %c0_40 = arith.constant 0 : index
    %c0_41 = arith.constant 0 : index
    %92 = vector.load %arg10[%c0_40, %c0_41] : memref<64x8xbf16, #tpu.memory_space<vmem>>, vector<64x8xbf16>
    %cst_42 = arith.constant dense<0.000000e+00> : vector<16x8xf32>
    %93 = tpu.matmul %91, %92, %cst_42 {dimension_numbers = #tpu.dot_dimension_numbers<[1], [0], [0], [1], [0, 0, 1, 1], [], []>} : vector<16x64xbf16>, vector<64x8xbf16>, vector<16x8xf32> -> vector<16x8xf32>
    %c0_43 = arith.constant 0 : index
    %c0_44 = arith.constant 0 : index
    %94 = vector.load %arg11[%c0_43, %c0_44] : memref<1x8xf32, #tpu.memory_space<vmem>>, vector<1x8xf32>
    %95 = vector.broadcast %94 : vector<1x8xf32> to vector<16x8xf32>
    %96 = arith.addf %93, %95 : vector<16x8xf32>
    %c0_45 = arith.constant 0 : index
    %c0_46 = arith.constant 0 : index
    %c0_47 = arith.constant 0 : index
    %97 = vector.load %arg12[%c0_45, %c0_46, %c0_47] : memref<1x16x8xf32, #tpu.memory_space<vmem>>, vector<1x16x8xf32>
    %98 = vector.shape_cast %97 : vector<1x16x8xf32> to vector<16x8xf32>
    %99 = vector.shape_cast %96 : vector<16x8xf32> to vector<1x16x8xf32>
    tpu.vector_store %arg12[%c0_45, %c0_46, %c0_47], %99 {strides = array<i32>} : memref<1x16x8xf32, #tpu.memory_space<vmem>>, vector<1x16x8xf32>,
    return
  }
  func.func @transform_0(%arg0: i32) -> (i32, i32, i32) {
    %c0_i32 = arith.constant 0 : i32
    %c0_i32_0 = arith.constant 0 : i32
    %c0_i32_1 = arith.constant 0 : i32
    return %arg0, %c0_i32, %c0_i32_0 : i32, i32, i32
  }
  func.func @transform_1(%arg0: i32) -> (i32, i32) {
    %c0_i32 = arith.constant 0 : i32
    %c0_i32_0 = arith.constant 0 : i32
    %c0_i32_1 = arith.constant 0 : i32
    return %c0_i32, %c0_i32_0 : i32, i32
  }
  func.func @transform_2(%arg0: i32) -> (i32, i32) {
    %c0_i32 = arith.constant 0 : i32
    %c0_i32_0 = arith.constant 0 : i32
    %c0_i32_1 = arith.constant 0 : i32
    return %c0_i32, %c0_i32_0 : i32, i32
  }
  func.func @transform_3(%arg0: i32) -> (i32, i32) {
    %c0_i32 = arith.constant 0 : i32
    %c0_i32_0 = arith.constant 0 : i32
    %c0_i32_1 = arith.constant 0 : i32
    return %c0_i32, %c0_i32_0 : i32, i32
  }
  func.func @transform_4(%arg0: i32) -> (i32, i32) {
    %c0_i32 = arith.constant 0 : i32
    %c0_i32_0 = arith.constant 0 : i32
    %c0_i32_1 = arith.constant 0 : i32
    return %c0_i32, %c0_i32_0 : i32, i32
  }
  func.func @transform_5(%arg0: i32) -> (i32, i32) {
    %c0_i32 = arith.constant 0 : i32
    %c0_i32_0 = arith.constant 0 : i32
    %c0_i32_1 = arith.constant 0 : i32
    return %c0_i32, %c0_i32_0 : i32, i32
  }
  func.func @transform_6(%arg0: i32) -> (i32, i32) {
    %c0_i32 = arith.constant 0 : i32
    %c0_i32_0 = arith.constant 0 : i32
    %c0_i32_1 = arith.constant 0 : i32
    return %c0_i32, %c0_i32_0 : i32, i32
  }
  func.func @transform_7(%arg0: i32) -> (i32, i32) {
    %c0_i32 = arith.constant 0 : i32
    %c0_i32_0 = arith.constant 0 : i32
    %c0_i32_1 = arith.constant 0 : i32
    return %c0_i32, %c0_i32_0 : i32, i32
  }
  func.func @transform_8(%arg0: i32) -> (i32, i32) {
    %c0_i32 = arith.constant 0 : i32
    %c0_i32_0 = arith.constant 0 : i32
    %c0_i32_1 = arith.constant 0 : i32
    return %c0_i32, %c0_i32_0 : i32, i32
  }
  func.func @transform_9(%arg0: i32) -> (i32, i32) {
    %c0_i32 = arith.constant 0 : i32
    %c0_i32_0 = arith.constant 0 : i32
    %c0_i32_1 = arith.constant 0 : i32
    return %c0_i32, %c0_i32_0 : i32, i32
  }
  func.func @transform_10(%arg0: i32) -> (i32, i32) {
    %c0_i32 = arith.constant 0 : i32
    %c0_i32_0 = arith.constant 0 : i32
    %c0_i32_1 = arith.constant 0 : i32
    return %c0_i32, %c0_i32_0 : i32, i32
  }
  func.func @transform_11(%arg0: i32) -> (i32, i32, i32) {
    %c0_i32 = arith.constant 0 : i32
    %c0_i32_0 = arith.constant 0 : i32
    %c0_i32_1 = arith.constant 0 : i32
    return %arg0, %c0_i32, %c0_i32_0 : i32, i32, i32
  }
}

</mosaic_0001>

<bundles_post_ra>
// kernel: tile.14
= control target key start
LH: loop header
LB: loop body
LE: loop exit
PB: predicated region body
PF: predicated region fallthrough
CT: control target
= control target key end

     0   :  { %vm163_vm0 = vcmask 1047556   ;;  %s305_s10 = smov 32   ;;  %vm165_vm1 = vcmask 261120   ;;  %vm202_vm2 = vcmask 523520   ;;  %s452_s0 = inlined_call_operand.vmem [shape: f32[32,2,32], index: 0, kind: input, shape index: {}]   ;;  %s453_s1 = inlined_call_operand.vmem [shape: f32[32,64], index: 1, kind: output, shape index: {}]  }
   0x1   :  { %v291_v0 = vld [vmem:[%s452_s0 + $0xe] sm:$0x3]  ;;  %v292_v1 = vld [vmem:[%s452_s0 + $0xc] sm:$0x3]  ;;  %v293_v2 = vld [vmem:[%s452_s0 + $0xa] sm:$0x3] }
   0x2   :  { %129 = vst [vmem:[#allocation0 + $0x38] sm:$0x3] %v291_v0  ;;  %134 = vst [vmem:[#allocation0 + $0x30] sm:$0x3] %v292_v1  ;;  %v294_v3 = vld [vmem:[%s452_s0 + $0x8] sm:$0x3] }
   0x3   :  { %139 = vst [vmem:[#allocation0 + $0x28] sm:$0x3] %v293_v2  ;;  %v295_v4 = vld [vmem:[%s452_s0 + $0x6] sm:$0x3]  ;;  %v296_v5 = vld [vmem:[%s452_s0 + $0x4] sm:$0x3] }
   0x4   :  { %144 = vst [vmem:[#allocation0 + $0x20] sm:$0x3] %v294_v3  ;;  %149 = vst [vmem:[#allocation0 + $0x18] sm:$0x3] %v295_v4  ;;  %v297_v6 = vld [vmem:[%s452_s0 + $0x2] sm:$0x3] }
   0x5   :  { %154 = vst [vmem:[#allocation0 + $0x10] sm:$0x3] %v296_v5  ;;  %v159_v7 = vld [vmem:[%s452_s0] sm:$0x3]  ;;  %158 = vst [vmem:[#allocation0 + $0x8] sm:$0x3] %v297_v6 }
   0x6   :  { %160 = vst [vmem:[#allocation0] sm:$0x3] %v159_v7  ;;  %v275_v8 = vld [vmem:[%s452_s0 + $0x2e] sm:$0x3]  ;;  %v276_v9 = vld [vmem:[%s452_s0 + $0x2c] sm:$0x3] }
   0x7   :  { %v277_v10 = vld [vmem:[%s452_s0 + $0x2a] sm:$0x3]  ;;  %49 = vst [vmem:[#allocation0 + $0xb8] sm:$0x3] %v275_v8  ;;  %54 = vst [vmem:[#allocation0 + $0xb0] sm:$0x3] %v276_v9 }
   0x8   :  { %59 = vst [vmem:[#allocation0 + $0xa8] sm:$0x3] %v277_v10  ;;  %v278_v11 = vld [vmem:[%s452_s0 + $0x28] sm:$0x3]  ;;  %v279_v12 = vld [vmem:[%s452_s0 + $0x26] sm:$0x3] }
   0x9   :  { %v280_v13 = vld [vmem:[%s452_s0 + $0x24] sm:$0x3]  ;;  %64 = vst [vmem:[#allocation0 + $0xa0] sm:$0x3] %v278_v11  ;;  %69 = vst [vmem:[#allocation0 + $0x98] sm:$0x3] %v279_v12 }
   0xa   :  { %74 = vst [vmem:[#allocation0 + $0x90] sm:$0x3] %v280_v13  ;;  %v281_v14 = vld [vmem:[%s452_s0 + $0x22] sm:$0x3]  ;;  %v282_v15 = vld [vmem:[%s452_s0 + $0x20] sm:$0x3] }
   0xb   :  { %v283_v16 = vld [vmem:[%s452_s0 + $0x1e] sm:$0x3]  ;;  %79 = vst [vmem:[#allocation0 + $0x88] sm:$0x3] %v281_v14  ;;  %84 = vst [vmem:[#allocation0 + $0x80] sm:$0x3] %v282_v15 }
   0xc   :  { %89 = vst [vmem:[#allocation0 + $0x78] sm:$0x3] %v283_v16  ;;  %v284_v17 = vld [vmem:[%s452_s0 + $0x1c] sm:$0x3]  ;;  %v285_v18 = vld [vmem:[%s452_s0 + $0x1a] sm:$0x3] }
   0xd   :  { %v286_v19 = vld [vmem:[%s452_s0 + $0x18] sm:$0x3]  ;;  %94 = vst [vmem:[#allocation0 + $0x70] sm:$0x3] %v284_v17  ;;  %99 = vst [vmem:[#allocation0 + $0x68] sm:$0x3] %v285_v18 }
   0xe   :  { %104 = vst [vmem:[#allocation0 + $0x60] sm:$0x3] %v286_v19  ;;  %v287_v20 = vld [vmem:[%s452_s0 + $0x16] sm:$0x3]  ;;  %v288_v21 = vld [vmem:[%s452_s0 + $0x14] sm:$0x3] }
   0xf   :  { %v289_v22 = vld [vmem:[%s452_s0 + $0x12] sm:$0x3]  ;;  %109 = vst [vmem:[#allocation0 + $0x58] sm:$0x3] %v287_v20  ;;  %114 = vst [vmem:[#allocation0 + $0x50] sm:$0x3] %v288_v21 }
  0x10   :  { %119 = vst [vmem:[#allocation0 + $0x48] sm:$0x3] %v289_v22  ;;  %v290_v23 = vld [vmem:[%s452_s0 + $0x10] sm:$0x3]  ;;  %v267_v24 = vld [vmem:[%s452_s0 + $0x3e] sm:$0x3] }
  0x11   :  { %v268_v25 = vld [vmem:[%s452_s0 + $0x3c] sm:$0x3]  ;;  %v197_v26 = vld [vmem:[#allocation0 + $0x1] ss:$8 sm:$0xf0]  }
  0x12   :  { %124 = vst [vmem:[#allocation0 + $0x40] sm:$0x3] %v290_v23  ;;  %9 = vst [vmem:[#allocation0 + $0xf8] sm:$0x3] %v267_v24  ;;  %v269_v27 = vld [vmem:[%s452_s0 + $0x3a] sm:$0x3] }
  0x13   :  { %14 = vst [vmem:[#allocation0 + $0xf0] sm:$0x3] %v268_v25  ;;  %v195_v28 = vld [vmem:[#allocation0 + $0x1] ss:$8 sm:$0xf]  }
  0x14   :  { %19 = vst [vmem:[#allocation0 + $0xe8] sm:$0x3] %v269_v27  ;;  %v270_v29 = vld [vmem:[%s452_s0 + $0x38] sm:$0x3]  ;;  %v199_v30 = vsel %vm163_vm0, %v197_v26, %v195_v28  ;;  %v271_v31 = vld [vmem:[%s452_s0 + $0x36] sm:$0x3] }
  0x15   :  { %24 = vst [vmem:[#allocation0 + $0xe0] sm:$0x3] %v270_v29  ;;  %v272_v32 = vld [vmem:[%s452_s0 + $0x34] sm:$0x3]  ;;  %v273_v33 = vld [vmem:[%s452_s0 + $0x32] sm:$0x3]  ;;  %200 = vrot.lane.b32.xlu0 %v199_v30, %s305_s10 }
  0x16   :  { %v218_v34 = vld [vmem:[#allocation0 + $0x81] ss:$8 sm:$0xf0]   ;;  %29 = vst [vmem:[#allocation0 + $0xd8] sm:$0x3] %v271_v31 }
  0x17   :  { %34 = vst [vmem:[#allocation0 + $0xd0] sm:$0x3] %v272_v32  ;;  %39 = vst [vmem:[#allocation0 + $0xc8] sm:$0x3] %v273_v33  ;;  %v274_v35 = vld [vmem:[%s452_s0 + $0x30] sm:$0x3] }
  0x18   :  { %v216_v36 = vld [vmem:[#allocation0 + $0x81] ss:$8 sm:$0xf]   ;;  %44 = vst [vmem:[#allocation0 + $0xc0] sm:$0x3] %v274_v35 }
  0x19   :  { %v161_v37 = vld [vmem:[#allocation0] ss:$8 sm:$0xf]   ;;  %v220_v38 = vsel %vm163_vm0, %v218_v34, %v216_v36  ;;  %v207_v39 = vld [vmem:[#allocation0 + $0x41] ss:$8 sm:$0xf0]  }
  0x1a   :  { %v162_v40 = vld [vmem:[#allocation0] ss:$8 sm:$0xf0]   ;;  %221 = vrot.lane.b32.xlu1 %v220_v38, %s305_s10  ;;  %v205_v44 = vld [vmem:[#allocation0 + $0x41] ss:$8 sm:$0xf]  }
  0x1b   :  { %v164_v41 = vsel %vm163_vm0, %v162_v40, %v161_v37  ;;  %v177_v42 = vld [vmem:[#allocation0 + $0x80] ss:$8 sm:$0xf]   ;;  %v209_v47 = vsel %vm163_vm0, %v207_v39, %v205_v44 }
  0x1c   :  { %v179_v43 = vld [vmem:[#allocation0 + $0x80] ss:$8 sm:$0xf0]   ;;  %166 = vst.msk [vmem:[%s453_s1] sm:$0xff] %vm165_vm1, %v164_v41   ;;  %210 = vrot.lane.b32.xlu0 %v209_v47, %s305_s10 }
  0x1d   :  { %v181_v45 = vsel %vm163_vm0, %v179_v43, %v177_v42  ;;  %v168_v46 = vld [vmem:[#allocation0 + $0x40] ss:$8 sm:$0xf]   ;;  %v229_v49 = vld [vmem:[#allocation0 + $0xc1] ss:$8 sm:$0xf0]  }
  0x1e   :  { %299 = vst.msk [vmem:[%s453_s1 + $0x10] sm:$0xff] %vm165_vm1, %v181_v45   ;;  %v170_v48 = vld [vmem:[#allocation0 + $0x40] ss:$8 sm:$0xf0]  }
  0x1f   :  { %v172_v50 = vsel %vm163_vm0, %v170_v48, %v168_v46  ;;  %v188_v51 = vld [vmem:[#allocation0 + $0xc0] ss:$8 sm:$0xf0]   ;;  %v227_v52 = vld [vmem:[#allocation0 + $0xc1] ss:$8 sm:$0xf]  }
  0x20   :  { %298 = vst.msk [vmem:[%s453_s1 + $0x8] sm:$0xff] %vm165_vm1, %v172_v50   ;;  %v186_v53 = vld [vmem:[#allocation0 + $0xc0] ss:$8 sm:$0xf]   ;;  %v231_v54 = vsel %vm163_vm0, %v229_v49, %v227_v52 }
  0x21   :  { %v190_v55 = vsel %vm163_vm0, %v188_v51, %v186_v53  ;;  %232 = vrot.lane.b32.xlu1 %v231_v54, %s305_s10 }
  0x22   :  { %300 = vst.msk [vmem:[%s453_s1 + $0x18] sm:$0xff] %vm165_vm1, %v190_v55  }
  0x87   :  { %v201_v56 = vpop.permute.xlu0 %200  }
  0x88   :  { %203 = vst.msk [vmem:[%s453_s1] sm:$0xff] %vm202_vm2, %v201_v56  }
  0x8c   :  { %v222_v57 = vpop.permute.xlu1 %221  }
  0x8d   :  { %302 = vst.msk [vmem:[%s453_s1 + $0x10] sm:$0xff] %vm202_vm2, %v222_v57  }
  0x8e   :  { %v211_v58 = vpop.permute.xlu0 %210  }
  0x8f   :  { %301 = vst.msk [vmem:[%s453_s1 + $0x8] sm:$0xff] %vm202_vm2, %v211_v58  }
  0x93   :  { %v233_v59 = vpop.permute.xlu1 %232  }
  0x94   :  { %303 = vst.msk [vmem:[%s453_s1 + $0x18] sm:$0xff] %vm202_vm2, %v233_v59  }

// kernel: tile.18
= control target key start
LH: loop header
LB: loop body
LE: loop exit
PB: predicated region body
PF: predicated region fallthrough
CT: control target
= control target key end

     0   :  { %s22_s0 = inlined_call_operand.vmem [shape: f32[4], index: 0, kind: input, shape index: {}]   ;;  %s23_s1 = inlined_call_operand.vmem [shape: f32[2,4], index: 1, kind: output, shape index: {}]  }
   0x1   :  { %v4_v0 = vld [vmem:[%s22_s0] ss:$0 sm:$0xff] }
   0x2   :  { %5 = vst [vmem:[%s23_s1] sm:$0x3] %v4_v0 }

// kernel: tile.19
= control target key start
LH: loop header
LB: loop body
LE: loop exit
PB: predicated region body
PF: predicated region fallthrough
CT: control target
= control target key end

     0   :  { %vm8_vm0 = vcmask 31744   ;;  %vm14_vm1 = vcmask 64544   ;;  %s42_s0 = inlined_call_operand.vmem [shape: f32[2,4], index: 0, kind: input, shape index: {}]   ;;  %s43_s1 = inlined_call_operand.vmem [shape: f32[1,8], index: 1, kind: output, shape index: {}]  }
   0x1   :  { %v5_v0 = vld [vmem:[%s42_s0] sm:$0x3]  ;;  %s25_s0 = smov 4  }
   0x2   :  { %6 = vst [vmem:[#allocation1] sm:$0x3] %v5_v0 }
   0x9   :  { %v11_v1 = vld [vmem:[#allocation1 + $0x1] sm:$0x1]   ;;  %v7_v2 = vld [vmem:[#allocation1] sm:$0x1]  }
   0xa   :  { %12 = vrot.lane.b32.xlu0 %v11_v1, %s25_s0  ;;  %9 = vst.msk [vmem:[#allocation0] sm:$0x1] %vm8_vm0, %v7_v2  }
  0x7c   :  { %v13_v3 = vpop.permute.xlu0 %12  }
  0x7d   :  { %15 = vst.msk [vmem:[#allocation0] sm:$0x1] %vm14_vm1, %v13_v3  }
  0x84   :  { %v20_v4 = vld [vmem:[#allocation0] sm:$0x1] }
  0x85   :  { %23 = vst [vmem:[%s43_s1] sm:$0x1] %v20_v4 }

// kernel: frequence_reconstructor.1
= control target key start
LH: loop header
LB: loop body
LE: loop exit
PB: predicated region body
PF: predicated region fallthrough
CT: control target
= control target key end

     0   :  { %vm89_vm0 = vcmask 130048   ;;  %vm239_vm1 = vcmask 1043456   ;;  %s1297_s15 = smov 8   ;;  %vm207_vm2 = vcmask 64512   ;;  %vm234_vm3 = vcmask 195584   ;;  %s1562_s0 = inlined_call_operand.vmem [shape: bf16[1,16,8], index: 0, kind: input, shape index: {}]   ;;  %s1563_s1 = inlined_call_operand.vmem [shape: bf16[96,16], index: 1, kind: input, shape index: {}]   ;;  %s1564_s2 = inlined_call_operand.vmem [shape: bf16[24,64], index: 2, kind: input, shape index: {}]   ;;  %s1565_s4 = inlined_call_operand.vmem [shape: bf16[16,16], index: 4, kind: input, shape index: {}]   ;;  %s1566_s5 = inlined_call_operand.vmem [shape: bf16[16,16], index: 5, kind: input, shape index: {}]   ;;  %s1567_s6 = inlined_call_operand.vmem [shape: f32[32,1], index: 6, kind: input, shape index: {}]   ;;  %s1568_s3 = inlined_call_operand.vmem [shape: f32[32,64], index: 3, kind: input, shape index: {}]   ;;  %s1569_s8 = inlined_call_operand.vmem [shape: bf16[16,16], index: 8, kind: input, shape index: {}]   ;;  %s1570_s7 = inlined_call_operand.vmem [shape: bf16[16,16], index: 7, kind: input, shape index: {}]   ;;  %s1571_s9 = inlined_call_operand.vmem [shape: bf16[64,8], index: 9, kind: input, shape index: {}]   ;;  %s1572_s10 = inlined_call_operand.vmem [shape: f32[1,8], index: 10, kind: input, shape index: {}]   ;;  %s1573_s11 = inlined_call_operand.vmem [shape: f32[1,16,8], index: 11, kind: output, shape index: {}]  }
   0x1   :  { %v1259_v0 = vld [vmem:[%s1562_s0] sm:$0xff]   ;;  %v1262_v3 = vld [vmem:[%s1563_s1 + $0x8] sm:$0xff]   ;;  %v1264_v5 = vld [vmem:[%s1563_s1 + $0x10] sm:$0xff]   ;;  %v1298_v36 = vmov 0.0   ;;  %vm1299_vm4 = vmmov 0   ;;  %v1300_v37 = vmov 0  }
   0x2   :  { %v1260_v1 = vld [vmem:[%s1563_s1] sm:$0xff]   ;;  %1176 = vmatprep.subr.bf16.mxu0 %v1259_v0  ;;  %1234 = vmatprep.subr.bf16.mxu1 %v1259_v0  ;;  %v1263_v4 = vld [vmem:[%s1563_s1 + $0x28] sm:$0xff]   ;;  %v1265_v6 = vld [vmem:[%s1563_s1 + $0x18] sm:$0xff]  }
   0x3   :  { %v1261_v2 = vld [vmem:[%s1563_s1 + $0x20] sm:$0xff]   ;;  %1177 = vmatpush3.bf16.msra.mxu0 %v1259_v0  ;;  %1235 = vmatpush3.bf16.msra.mxu1 %v1259_v0  ;;  %v1266_v9 = vld [vmem:[%s1564_s2 + $0x8] ss:$0 sps:$4 sm:$0xff]   ;;  %s1296_s1 = smov 16   ;;  %v361_v38 = vld [vmem:[%s1567_s6 + $0x18] sm:$0xff] }
   0x4   :  { %1178 = vmatprep.mubr.msk.bf16.mxu0 %vm89_vm0, %v1260_v1  ;;  %1186 = vmatprep.mubr.msk.bf16.mxu1 %vm89_vm0, %v1261_v2  ;;  %v241_v12 = vsel %vm239_vm1, %v1266_v9, 0  ;;  %v1267_v15 = vld [vmem:[%s1564_s2] sm:$0xff]   ;;  %v360_v39 = vld [vmem:[%s1567_s6 + $0x10] sm:$0xff]  ;;  %v359_v41 = vld [vmem:[%s1567_s6 + $0x8] sm:$0xff] }
   0x5   :  { %1236 = vmatprep.subr.msk.bf16.mxu1 %vm239_vm1, %v1266_v9  ;;  %1210 = vmatprep.subr.bf16.mxu0 %v1298_v36  ;;  %v358_v40 = vld [vmem:[%s1567_s6] sm:$0xff]  ;;  %v223_v44 = vld [vmem:[%s1568_s3 + $0x10] sm:$0xff]  ;;  %v224_v47 = vld [vmem:[%s1568_s3 + $0x18] sm:$0xff] }
   0x6   :  { %1179 = vmatmul.mubr.msk.bf16.vlgmr.msra.gmra.mxu0 %vm89_vm0, %v1262_v3  ;;  %1187 = vmatmul.mubr.msk.bf16.vlgmr.msra.gmra.mxu1 %vm89_vm0, %v1263_v4  ;;  %v221_v43 = vld [vmem:[%s1568_s3] sm:$0xff]  ;;  %v222_v49 = vld [vmem:[%s1568_s3 + $0x8] sm:$0xff] }
   0x7   :  { %1182 = vmatprep.mubr.msk.bf16.mxu0 %vm89_vm0, %v1264_v5  ;;  %1191 = vmatpush3.bf16.msra.mxu1 %v241_v12  ;;  %v1268_v61 = vld [vmem:[%s1565_s4] sm:$0xff]  }
   0x8   :  { %1192 = vmatprep.subr.bf16.mxu1 %v1267_v15  ;;  %1258 = vset.pattern.permute.xlu1 %v1300_v37 }
   0x9   :  { %1257 = vset.pattern.permute.xlu0 %v1300_v37 }
   0xb   :  { %1193 = vmatpush3.bf16.msra.mxu1 %v1267_v15 }
   0xc   :  { %1198 = vmatprep.subr.bf16.mxu1 %v1298_v36 }
   0xe   :  { %1183 = vmatmul.mubr.msk.bf16.gmra.mxu0 %vm89_vm0, %v1265_v6 }
   0xf   :  { %1212 = vmatprep.mubr.msk.bf16.mxu0 %vm1299_vm4, %v1298_v36 }
  0xc6   :  { %v1180_v7 = vpop.f32.mrf.mxu0  ;;  %v1188_v8 = vpop.f32.mrf.mxu1 }
  0xc8   :  { %v142_v10 = vpop.f32.mrf.mxu0  ;;  %v174_v11 = vpop.f32.mrf.mxu1 }
  0xca   :  { %v1181_v13 = vpop.f32.mrf.mxu0  ;;  %v1189_v14 = vpop.f32.mrf.mxu1 }
  0xcb   :  { %v190_v16 = vpack.c.bf16 %v1181_v13, %v1180_v7  ;;  %v194_v22 = vpack.c.bf16 %v1189_v14, %v1188_v8 }
  0xcc   :  { %v145_v17 = vpop.f32.mrf.mxu0  ;;  %v177_v18 = vpop.f32.mrf.mxu1 }
  0xcd   :  { %v189_v19 = vpack.c.bf16 %v145_v17, %v142_v10  ;;  %v193_v20 = vpack.c.bf16 %v177_v18, %v174_v11 }
  0xce   :  { %v1184_v21 = vpop.f32.mrf.mxu0 }
  0xcf   :  { %203 = vrot.lane.b32.xlu1 %v193_v20, %s1296_s1 }
  0xd0   :  { %v158_v23 = vpop.f32.mrf.mxu0 }
  0xd2   :  { %v1185_v24 = vpop.f32.mrf.mxu0 }
  0xd3   :  { %205 = vrot.lane.b32.xlu1 %v194_v22, %s1296_s1  ;;  %v192_v27 = vpack.c.bf16 %v1185_v24, %v1184_v21 }
  0xd4   :  { %v161_v25 = vpop.f32.mrf.mxu0 }
  0xd5   :  { %v191_v26 = vpack.c.bf16 %v161_v25, %v158_v23 }
  0xd7   :  { %197 = vrot.lane.b32.xlu0 %v191_v26, %s1297_s15  ;;  %434 = vperm.xlu1 %1258, %v361_v38  }
  0xdb   :  { %199 = vrot.lane.b32.xlu0 %v192_v27, %s1297_s15  ;;  %367 = vperm.xlu1 %1258, %v358_v40  }
  0xdf   :  { %429 = vperm.xlu0 %1257, %v360_v39  }
  0xe3   :  { %372 = vperm.xlu0 %1257, %v359_v41  }
 0x141   :  { %v204_v28 = vpop.permute.xlu1 %203 }
 0x145   :  { %v206_v33 = vpop.permute.xlu1 %205 }
 0x149   :  { %v198_v29 = vpop.permute.xlu0 %197 }
 0x14a   :  { %v210_v30 = vsel %vm207_vm2, %v189_v19, %v198_v29 }
 0x14b   :  { %v215_v31 = vsel %vm89_vm0, %v210_v30, %v204_v28 }
 0x14c   :  { %1194 = vmatprep.mubr.msk.bf16.mxu1 %vm234_vm3, %v215_v31 }
 0x14d   :  { %v200_v32 = vpop.permute.xlu0 %199 }
 0x14e   :  { %v213_v34 = vsel %vm207_vm2, %v190_v16, %v200_v32 }
 0x14f   :  { %v217_v35 = vsel %vm89_vm0, %v213_v34, %v206_v33 }
 0x150   :  { %1195 = vmatmul.mubr.msk.bf16.vlgmr.msra.gmra.mxu1 %vm234_vm3, %v217_v35 }
 0x151   :  { %1200 = vmatprep.mubr.msk.bf16.mxu1 %vm1299_vm4, %v1298_v36 }
 0x210   :  { %v1196_v42 = vpop.f32.mrf.mxu1 }
 0x211   :  { %v286_v50 = vadd.f32 %v1196_v42, %v223_v44 }
 0x212   :  { %v277_v45 = vpop.f32.mrf.mxu1 }
 0x213   :  { %v278_v46 = vadd.f32 %v277_v45, %v221_v43 }
 0x214   :  { %v1197_v48 = vpop.f32.mrf.mxu1 }
 0x215   :  { %v296_v51 = vadd.f32 1e-05, %v278_v46  ;;  %v292_v53 = vsub.f32 %v278_v46, %v286_v50  ;;  %v289_v54 = vadd.f32 %v1197_v48, %v224_v47 }
 0x216   :  { %v280_v52 = vpop.f32.mrf.mxu1 }
 0x217   :  { %1276 = vrcp.f32 %v296_v51  ;;  %v281_v55 = vadd.f32 %v280_v52, %v222_v49  ;;  %v294_v58 = vmul.f32 %v292_v53, %v292_v53  ;;  %v1301_v49 = vmov 1.0  }
 0x219   :  { %v293_v56 = vsub.f32 %v281_v55, %v289_v54  ;;  %v297_v57 = vadd.f32 1e-05, %v281_v55  ;;  %v1269_v55 = vld [vmem:[%s1566_s5] sm:$0xff]  }
 0x21b   :  { %v295_v59 = vmul.f32 %v293_v56, %v293_v56  ;;  %1278 = vrcp.f32 %v297_v57 }
 0x21d   :  { %v364_v60 = vpack.c.bf16 %v295_v59, %v294_v58 }
 0x21f   :  { %1199 = vmatpush3.bf16.msra.mxu1 %v364_v60  ;;  %v430_v60 = vpop.permute.xlu0 %429 }
 0x220   :  { %1204 = vmatprep.subr.bf16.mxu1 %v1298_v36 }
 0x222   :  { %1201 = vmatmul.mubr.msk.bf16.vlgmr.msra.gmra.mxu1 %vm89_vm0, %v1268_v61 }
 0x223   :  { %1206 = vmatprep.mubr.msk.bf16.mxu1 %vm1299_vm4, %v1298_v36 }
 0x224   :  { %v1277_v62 = vpop.eup %1276 }
 0x225   :  { %v300_v63 = vmul.f32 %v1277_v62, %v286_v50 }
 0x227   :  { %v306_v0 = vand.u32 2147483647, %v300_v63  ;;  %vm302_vm9 = vcmp.lt.f32.partialorder %v300_v63, 0.0 }
 0x228   :  { %v1279_v1 = vpop.eup %1278  ;;  %v304_v50 = vsel %vm302_vm9, -1.0, %v1301_v49 }
 0x229   :  { %v301_v2 = vmul.f32 %v1279_v1, %v289_v54  ;;  %v312_v3 = vadd.f32 1e-30, %v306_v0  ;;  %v320_v4 = vadd.f32 1.0, %v306_v0  ;;  %v1116_v9 = vadd.f32 -1.0, %v306_v0 }
 0x22a   :  { %vm310_vm5 = vcmp.gt.f32.partialorder %v306_v0, 0.41421357  ;;  %vm308_vm6 = vcmp.gt.f32.partialorder %v306_v0, 2.4142137 }
 0x22b   :  { %v307_v5 = vand.u32 2147483647, %v301_v2  ;;  %1280 = vrcp.f32 %v312_v3  ;;  %v330_v39 = vsel %vm310_vm5, 0.7853982, %v1298_v36  ;;  %vm303_vm10 = vcmp.lt.f32.partialorder %v301_v2, 0.0  ;;  %v435_v2 = vpop.permute.xlu1 %434 }
 0x22c   :  { %1282 = vrcp.f32 %v320_v4  ;;  %v332_v44 = vsel %vm308_vm6, 1.5707964, %v330_v39  ;;  %v305_v51 = vsel %vm303_vm10, -1.0, %v1301_v49 }
 0x22d   :  { %v313_v6 = vadd.f32 1e-30, %v307_v5  ;;  %v321_v7 = vadd.f32 1.0, %v307_v5  ;;  %v1117_v14 = vadd.f32 -1.0, %v307_v5  ;;  %vm311_vm7 = vcmp.gt.f32.partialorder %v307_v5, 0.41421357 }
 0x22e   :  { %vm309_vm8 = vcmp.gt.f32.partialorder %v307_v5, 2.4142137  ;;  %v331_v42 = vsel %vm311_vm7, 0.7853982, %v1298_v36 }
 0x22f   :  { %1284 = vrcp.f32 %v313_v6  ;;  %v333_v47 = vsel %vm309_vm8, 1.5707964, %v331_v42 }
 0x230   :  { %1286 = vrcp.f32 %v321_v7 }
 0x238   :  { %v1281_v8 = vpop.eup %1280 }
 0x239   :  { %v1283_v10 = vpop.eup %1282  ;;  %v316_v11 = vsub.f32 0.0, %v1281_v8 }
 0x23a   :  { %v324_v12 = vmul.f32 %v1283_v10, %v1116_v9 }
 0x23c   :  { %v1285_v13 = vpop.eup %1284  ;;  %v326_v15 = vsel %vm310_vm5, %v324_v12, %v306_v0 }
 0x23d   :  { %v1287_v16 = vpop.eup %1286  ;;  %v317_v17 = vsub.f32 0.0, %v1285_v13  ;;  %v328_v18 = vsel %vm308_vm6, %v316_v11, %v326_v15 }
 0x23e   :  { %v325_v19 = vmul.f32 %v1287_v16, %v1117_v14  ;;  %v334_v20 = vmul.f32 %v328_v18, %v328_v18 }
 0x240   :  { %v327_v21 = vsel %vm311_vm7, %v325_v19, %v307_v5  ;;  %v336_v22 = vmul.f32 0.080537446, %v334_v20 }
 0x241   :  { %v329_v23 = vsel %vm309_vm8, %v317_v17, %v327_v21 }
 0x242   :  { %v335_v24 = vmul.f32 %v329_v23, %v329_v23  ;;  %v1118_v25 = vadd.f32 -0.13877685, %v336_v22 }
 0x244   :  { %v337_v26 = vmul.f32 0.080537446, %v335_v24  ;;  %v340_v27 = vmul.f32 %v1118_v25, %v334_v20 }
 0x246   :  { %v1119_v28 = vadd.f32 -0.13877685, %v337_v26  ;;  %v342_v29 = vadd.f32 0.19977711, %v340_v27  ;;  %v1304_v26 = vmov 2131351028  }
 0x248   :  { %v341_v30 = vmul.f32 %v1119_v28, %v335_v24  ;;  %v344_v31 = vmul.f32 %v342_v29, %v334_v20  ;;  %v1305_v28 = vmov 2102212464  }
 0x24a   :  { %v343_v32 = vadd.f32 0.19977711, %v341_v30  ;;  %v1120_v33 = vadd.f32 -0.3333295, %v344_v31  ;;  %v1306_v30 = vmov 920167782  }
 0x24c   :  { %v345_v34 = vmul.f32 %v343_v32, %v335_v24  ;;  %v348_v35 = vmul.f32 %v1120_v33, %v334_v20  ;;  %v1302_v20 = vmov 683565275  }
 0x24e   :  { %v1121_v37 = vadd.f32 -0.3333295, %v345_v34  ;;  %v350_v38 = vmul.f32 %v348_v35, %v328_v18 }
 0x250   :  { %v349_v40 = vmul.f32 %v1121_v37, %v335_v24  ;;  %v352_v41 = vadd.f32 %v350_v38, %v328_v18  ;;  %v1303_v24 = vmov 2475754826   ;;  %v1307_v38 = vmov 1326507024  }
 0x252   :  { %v351_v43 = vmul.f32 %v349_v40, %v329_v23  ;;  %v354_v46 = vadd.f32 %v352_v41, %v332_v44 }
 0x254   :  { %v353_v45 = vadd.f32 %v351_v43, %v329_v23  ;;  %v356_v52 = vmul.f32 %v354_v46, %v304_v50 }
 0x256   :  { %v355_v48 = vadd.f32 %v353_v45, %v333_v47 }
 0x258   :  { %v357_v53 = vmul.f32 %v355_v48, %v305_v51 }
 0x25a   :  { %v426_v54 = vpack.c.bf16 %v357_v53, %v356_v52 }
 0x25c   :  { %1205 = vmatpush3.bf16.msra.mxu1 %v426_v54 }
 0x25d   :  { %1216 = vmatprep.subr.bf16.mxu1 %v1298_v36 }
 0x25f   :  { %1207 = vmatmul.mubr.msk.bf16.vlgmr.msra.gmra.mxu1 %vm89_vm0, %v1269_v55 }
 0x260   :  { %1218 = vmatprep.mubr.msk.bf16.mxu1 %vm1299_vm4, %v1298_v36 }
 0x2e2   :  { %v1459_v56 = vpop.f32.mrf.mxu1 }
 0x2e4   :  { %v1202_v57 = vpop.f32.mrf.mxu1 }
 0x2e6   :  { %v1461_v58 = vpop.f32.mrf.mxu1 }
 0x2e8   :  { %v1203_v59 = vpop.f32.mrf.mxu1 }
 0x31f   :  { %v479_v61 = vpop.f32.mrf.mxu1 }
 0x320   :  { %v1463_v62 = vadd.f32 %v479_v61, %v430_v60 }
 0x321   :  { %v1208_v63 = vpop.f32.mrf.mxu1 }
 0x322   :  { %v486_v0 = vand.u32 2147483647, %v1463_v62  ;;  %v489_v1 = vand.u32 2139095040, %v1463_v62 }
 0x323   :  { %v482_v3 = vpop.f32.mrf.mxu1 }
 0x324   :  { %v490_v4 = vshrl.u32 %v489_v1, 23  ;;  %v1467_v5 = vadd.f32 %v482_v3, %v435_v2  ;;  %v493_v6 = vand.u32 8388607, %v486_v0 }
 0x325   :  { %v1209_v7 = vpop.f32.mrf.mxu1 }
 0x326   :  { %v1126_v8 = vadd.s32 4294967169, %v490_v4  ;;  %v592_v9 = vand.u32 2139095040, %v1467_v5  ;;  %v494_v11 = vor.u32 8388608, %v493_v6  ;;  %v589_v13 = vand.u32 2147483647, %v1467_v5 }
 0x328   :  { %v496_v10 = vadd.s32 1, %v1126_v8  ;;  %v593_v12 = vshrl.u32 %v592_v9, 23  ;;  %v1473_v18 = vshll.u32 %v494_v11, 8  ;;  %v596_v22 = vand.u32 8388607, %v589_v13 }
 0x32a   :  { %vm497_vm11 = vcmp.gt.s32.totalorder %v496_v10, 0  ;;  %v1130_v15 = vadd.s32 4294967169, %v593_v12  ;;  %v597_v53 = vor.u32 8388608, %v596_v22 }
 0x32b   :  { %v498_v14 = vsel %vm497_vm11, %v496_v10, 0 }
 0x32c   :  { %v499_v16 = vshrl.u32 %v498_v14, 5  ;;  %v500_v17 = vand.u32 31, %v498_v14  ;;  %v599_v23 = vadd.s32 1, %v1130_v15  ;;  %v637_v7 = vshll.u32 %v597_v53, 8 }
 0x32e   :  { %v501_v19 = vsub.s32 32, %v500_v17  ;;  %v503_v21 = vshll.u32 %v1302_v20, %v500_v17  ;;  %v506_v25 = vshll.u32 %v1303_v24, %v500_v17  ;;  %v509_v27 = vshll.u32 %v1304_v26, %v500_v17 }
 0x32f   :  { %v512_v29 = vshll.u32 %v1305_v28, %v500_v17  ;;  %v515_v31 = vshll.u32 %v1306_v30, %v500_v17  ;;  %vm518_vm12 = vcmp.lt.s32.totalorder %v499_v16, 1  ;;  %vm520_vm13 = vcmp.lt.s32.totalorder %v499_v16, 3 }
 0x330   :  { %v504_v32 = vshrl.u32 %v1303_v24, %v501_v19  ;;  %v507_v33 = vshrl.u32 %v1304_v26, %v501_v19  ;;  %v510_v34 = vshrl.u32 %v1305_v28, %v501_v19  ;;  %v502_v35 = vshrl.u32 %v1302_v20, %v501_v19 }
 0x331   :  { %v513_v37 = vshrl.u32 %v1306_v30, %v501_v19  ;;  %v516_v39 = vshrl.u32 %v1307_v38, %v501_v19  ;;  %vm600_vm14 = vcmp.gt.s32.totalorder %v599_v23, 0  ;;  %vm521_vm15 = vcmp.lt.s32.totalorder %v499_v16, 4 }
 0x332   :  { %v505_v40 = vor.u32 %v504_v32, %v503_v21  ;;  %v508_v41 = vor.u32 %v507_v33, %v506_v25  ;;  %v511_v42 = vor.u32 %v510_v34, %v509_v27  ;;  %v601_v45 = vsel %vm600_vm14, %v599_v23, 0 }
 0x333   :  { %v514_v43 = vor.u32 %v513_v37, %v512_v29  ;;  %v517_v44 = vor.u32 %v516_v39, %v515_v31  ;;  %vm519_vm1 = vcmp.lt.s32.totalorder %v499_v16, 2  ;;  %v603_v57 = vand.u32 31, %v601_v45 }
 0x334   :  { %v522_v46 = vsel %vm518_vm12, %v502_v35, %v505_v40  ;;  %v523_v47 = vsel %vm521_vm15, %v511_v42, 2102212464  ;;  %v526_v48 = vsel %vm518_vm12, %v505_v40, %v508_v41  ;;  %v530_v49 = vsel %vm518_vm12, %v508_v41, %v511_v42 }
 0x335   :  { %v524_v50 = vsel %vm520_vm13, %v508_v41, %v523_v47  ;;  %v527_v51 = vsel %vm521_vm15, %v514_v43, 920167782  ;;  %v531_v52 = vsel %vm521_vm15, %v517_v44, 1326507024  ;;  %v602_v4 = vshrl.u32 %v601_v45, 5 }
 0x336   :  { %v528_v54 = vsel %vm520_vm13, %v511_v42, %v527_v51  ;;  %v532_v55 = vsel %vm520_vm13, %v514_v43, %v531_v52  ;;  %v525_v59 = vsel %vm519_vm1, %v522_v46, %v524_v50  ;;  %v604_v6 = vsub.s32 32, %v603_v57 }
 0x337   :  { %v529_v60 = vsel %vm519_vm1, %v526_v48, %v528_v54  ;;  %v533_v61 = vsel %vm519_vm1, %v530_v49, %v532_v55  ;;  %v541_v8 = vmul.u32 %v1473_v18, %v525_v59  ;;  %v606_v9 = vshll.u32 %v1302_v20, %v603_v57 }
 0x338   :  { %v1486_v63 = vmul.u32.u64.low %v1473_v18, %v533_v61  ;;  %v1487_v1 = vmul.u32.u64.high %v1473_v18, %v533_v61, %v1486_v63  ;;  %v1490_v2 = vmul.u32.u64.low %v1473_v18, %v529_v60  ;;  %v1491_v3 = vmul.u32.u64.high %v1473_v18, %v529_v60, %v1490_v2 }
 0x339   :  { %v609_v10 = vshll.u32 %v1303_v24, %v603_v57  ;;  %v612_v11 = vshll.u32 %v1304_v26, %v603_v57  ;;  %v607_v12 = vshrl.u32 %v1303_v24, %v604_v6  ;;  %v610_v14 = vshrl.u32 %v1304_v26, %v604_v6 }
 0x33a   :  { %v613_v15 = vshrl.u32 %v1305_v28, %v604_v6  ;;  %v615_v16 = vshll.u32 %v1305_v28, %v603_v57  ;;  %vm543_vm3 = vc.u32 %v1487_v1, %v1490_v2  ;;  %v544_v17 = vadd.s32 1, %v1491_v3 }
 0x33b   :  { %v616_v19 = vshrl.u32 %v1306_v30, %v604_v6  ;;  %v618_v21 = vshll.u32 %v1306_v30, %v603_v57  ;;  %v608_v22 = vor.u32 %v607_v12, %v606_v9  ;;  %v611_v23 = vor.u32 %v610_v14, %v609_v10 }
 0x33c   :  { %v614_v25 = vor.u32 %v613_v15, %v612_v11  ;;  %v619_v27 = vshrl.u32 %v1307_v38, %v604_v6  ;;  %v545_v18 = vsel %vm543_vm3, %v544_v17, %v1491_v3  ;;  %vm621_vm5 = vcmp.lt.s32.totalorder %v602_v4, 1 }
 0x33d   :  { %v617_v29 = vor.u32 %v616_v19, %v615_v16  ;;  %vm624_vm6 = vcmp.lt.s32.totalorder %v602_v4, 4  ;;  %v546_v24 = vadd.s32 %v545_v18, %v541_v8  ;;  %vm623_vm7 = vcmp.lt.s32.totalorder %v602_v4, 3 }
 0x33e   :  { %v620_v26 = vor.u32 %v619_v27, %v618_v21  ;;  %v626_v28 = vsel %vm624_vm6, %v614_v25, 2102212464  ;;  %v605_v31 = vshrl.u32 %v1302_v20, %v604_v6  ;;  %v629_v32 = vsel %vm621_vm5, %v608_v22, %v611_v23 }
 0x33f   :  { %v630_v33 = vsel %vm624_vm6, %v617_v29, 920167782  ;;  %v633_v34 = vsel %vm621_vm5, %v611_v23, %v614_v25  ;;  %v547_v35 = vadd.s32 536870912, %v546_v24  ;;  %vm622_vm8 = vcmp.lt.s32.totalorder %v602_v4, 2 }
 0x340   :  { %v631_v30 = vsel %vm623_vm7, %v614_v25, %v630_v33  ;;  %v634_v37 = vsel %vm624_vm6, %v620_v26, 1326507024  ;;  %v625_v39 = vsel %vm621_vm5, %v605_v31, %v608_v22  ;;  %v627_v38 = vsel %vm623_vm7, %v611_v23, %v626_v28 }
 0x341   :  { %v632_v40 = vsel %vm622_vm8, %v629_v32, %v631_v30  ;;  %v635_v41 = vsel %vm623_vm7, %v617_v29, %v634_v37  ;;  %v548_v42 = vshrl.u32 %v547_v35, 30  ;;  %v628_v48 = vsel %vm622_vm8, %v625_v39, %v627_v38 }
 0x342   :  { %v636_v43 = vsel %vm622_vm8, %v633_v34, %v635_v41  ;;  %v1501_v44 = vmul.u32.u64.low %v637_v7, %v632_v40  ;;  %v1502_v45 = vmul.u32.u64.high %v637_v7, %v632_v40, %v1501_v44  ;;  %v644_v51 = vmul.u32 %v637_v7, %v628_v48 }
 0x343   :  { %v1504_v46 = vmul.u32.u64.low %v637_v7, %v636_v43  ;;  %v1505_v47 = vmul.u32.u64.high %v637_v7, %v636_v43, %v1504_v46  ;;  %v549_v20 = vshll.u32 %v548_v42, 30  ;;  %v542_v6 = vadd.s32 %v1490_v2, %v1487_v1 }
 0x344   :  { %v647_v50 = vadd.s32 1, %v1502_v45  ;;  %vm488_vm12 = vcmp.lt.s32.totalorder %v1463_v62, 0  ;;  %vm487_vm13 = vcmp.le.f32.partialorder %v486_v0, 0.7853982  ;;  %vm591_vm14 = vcmp.lt.s32.totalorder %v1467_v5, 0 }
 0x345   :  { %v550_v49 = vsub.s32 %v546_v24, %v549_v20  ;;  %vm646_vm9 = vc.u32 %v1505_v47, %v1501_v44  ;;  %v645_v18 = vadd.s32 %v1501_v44, %v1505_v47  ;;  %v572_v24 = vsub.s32 4, %v548_v42  ;;  %v368_v47 = vpop.permute.xlu1 %367 }
 0x346   :  { %v648_v53 = vsel %vm646_vm9, %v647_v50, %v1502_v45  ;;  %vm590_vm15 = vcmp.le.f32.partialorder %v589_v13, 0.7853982  ;;  %vm578_vm9 = vweird.f32 %v1463_v62 }
 0x347   :  { %v552_v52 = vsub.s32 0, %v550_v49  ;;  %v649_v54 = vadd.s32 %v648_v53, %v644_v51  ;;  %v573_v30 = vsel %vm488_vm12, %v572_v24, %v548_v42  ;;  %v418_v51 = vadd.f32 %v1459_v56, %v368_v47  ;;  %v1271_v24 = vld [vmem:[%s1570_s7] sm:$0xff]  }
 0x348   :  { %v575_v40 = vsel %vm487_vm13, 0, %v573_v30 }
 0x349   :  { %v1127_v55 = vmin.u32 %v552_v52, %v550_v49  ;;  %v650_v57 = vadd.s32 536870912, %v649_v54  ;;  %v788_v43 = vadd.s32 3, %v575_v40  ;;  %v579_v20 = vand.u32 3, %v575_v40 }
 0x34b   :  { %v554_v59 = vclz %v1127_v55  ;;  %v651_v60 = vshrl.u32 %v650_v57, 30  ;;  %v789_v42 = vand.u32 3, %v788_v43  ;;  %vm584_vm3 = vcmp.eq.s32.totalorder %v579_v20, 2 }
 0x34c   :  { %vm581_vm6 = vcmp.eq.s32.totalorder %v579_v20, 0  ;;  %vm580_vm8 = vcmp.lt.s32.totalorder %v579_v20, 2 }
 0x34d   :  { %v1128_v61 = vadd.s32 4294967294, %v554_v59  ;;  %v652_v63 = vshll.u32 %v651_v60, 30  ;;  %v675_v45 = vsub.s32 4, %v651_v60  ;;  %vm794_vm1 = vcmp.eq.s32.totalorder %v789_v42, 2 }
 0x34e   :  { %vm791_vm5 = vcmp.eq.s32.totalorder %v789_v42, 0  ;;  %vm790_vm7 = vcmp.lt.s32.totalorder %v789_v42, 2 }
 0x34f   :  { %vm1129_vm10 = vcmp.lt.s32.totalorder %v1128_v61, 0  ;;  %v653_v4 = vsub.s32 %v649_v54, %v652_v63  ;;  %v676_v48 = vsel %vm591_vm14, %v675_v45, %v651_v60 }
 0x350   :  { %v557_v3 = vsel %vm1129_vm10, 0, %v1128_v61  ;;  %v678_v53 = vsel %vm590_vm15, 0, %v676_v48 }
 0x351   :  { %v558_v8 = vsub.s32 32, %v557_v3  ;;  %v562_v7 = vsub.s32 4294967266, %v557_v3  ;;  %v655_v9 = vsub.s32 0, %v653_v4  ;;  %v559_v10 = vshll.u32 %v550_v49, %v557_v3 }
 0x352   :  { %v892_v61 = vadd.s32 3, %v678_v53 }
 0x353   :  { %v560_v11 = vshrl.u32 %v542_v6, %v558_v8  ;;  %v563_v12 = vadd.s32 127, %v562_v7  ;;  %v1131_v14 = vmin.u32 %v655_v9, %v653_v4  ;;  %v682_v8 = vand.u32 3, %v678_v53 }
 0x354   :  { %v893_v7 = vand.u32 3, %v892_v61 }
 0x355   :  { %v561_v15 = vor.u32 %v560_v11, %v559_v10  ;;  %v564_v16 = vshll.u32 %v563_v12, 23  ;;  %v657_v17 = vclz %v1131_v14  ;;  %v373_v12 = vpop.permute.xlu0 %372 }
 0x356   :  { %vm898_vm10 = vcmp.eq.s32.totalorder %v893_v7, 2 }
 0x357   :  { %v565_v19 = vor.u32 4788187, %v564_v16  ;;  %v1132_v21 = vadd.s32 4294967294, %v657_v17  ;;  %v568_v23 = vcvt.s32.f32 %v561_v15 }
 0x359   :  { %v566_v22 = vand.u32 2147483647, %v565_v19  ;;  %vm1133_vm11 = vcmp.lt.s32.totalorder %v1132_v21, 0  ;;  %v421_v19 = vadd.f32 %v1461_v58, %v373_v12  ;;  %v1272_v58 = vld [vmem:[%s1571_s9 + $0x18] sm:$0xff]  }
 0x35a   :  { %v660_v27 = vsel %vm1133_vm11, 0, %v1132_v21  ;;  %vm687_vm11 = vcmp.eq.s32.totalorder %v682_v8, 2 }
 0x35b   :  { %v569_v25 = vmul.f32 %v568_v23, %v566_v22  ;;  %v661_v1 = vsub.s32 32, %v660_v27  ;;  %v665_v2 = vsub.s32 4294967266, %v660_v27  ;;  %v662_v26 = vshll.u32 %v653_v4, %v660_v27 }
 0x35d   :  { %v570_v29 = vxor.u32 2147483648, %v569_v25  ;;  %v663_v28 = vshrl.u32 %v645_v18, %v661_v1  ;;  %v666_v31 = vadd.s32 127, %v665_v2 }
 0x35f   :  { %v571_v32 = vsel %vm488_vm12, %v570_v29, %v569_v25  ;;  %v664_v34 = vor.u32 %v663_v28, %v662_v26  ;;  %v667_v35 = vshll.u32 %v666_v31, 23  ;;  %vm895_vm12 = vcmp.eq.s32.totalorder %v893_v7, 0  ;;  %v1270_v29 = vld [vmem:[%s1569_s8] sm:$0xff]   ;;  %v1274_v26 = vld [vmem:[%s1571_s9 + $0x8] sm:$0xff]  }
 0x360   :  { %v574_v33 = vsel %vm487_vm13, %v1463_v62, %v571_v32  ;;  %vm684_vm13 = vcmp.eq.s32.totalorder %v682_v8, 0  ;;  %v1275_v28 = vld [vmem:[%s1571_s9] sm:$0xff]  }
 0x361   :  { %1288 = vcosq.f32 %v574_v33  ;;  %v668_v37 = vor.u32 4788187, %v667_v35  ;;  %v671_v38 = vcvt.s32.f32 %v664_v34 }
 0x362   :  { %1290 = vsinq.f32 %v574_v33 }
 0x363   :  { %v669_v39 = vand.u32 2147483647, %v668_v37 }
 0x365   :  { %v672_v41 = vmul.f32 %v671_v38, %v669_v39 }
 0x367   :  { %v673_v44 = vxor.u32 2147483648, %v672_v41 }
 0x369   :  { %v674_v0 = vsel %vm591_vm14, %v673_v44, %v672_v41  ;;  %vm894_vm14 = vcmp.lt.s32.totalorder %v893_v7, 2 }
 0x36a   :  { %v677_v46 = vsel %vm590_vm15, %v1467_v5, %v674_v0  ;;  %vm683_vm15 = vcmp.lt.s32.totalorder %v682_v8, 2 }
 0x36b   :  { %1292 = vcosq.f32 %v677_v46 }
 0x36c   :  { %1294 = vsinq.f32 %v677_v46 }
 0x36e   :  { %v1289_v49 = vpop.eup %1288 }
 0x36f   :  { %v1291_v50 = vpop.eup %1290  ;;  %v585_v52 = vxor.u32 2147483648, %v1289_v49 }
 0x370   :  { %v582_v54 = vxor.u32 2147483648, %v1291_v50 }
 0x371   :  { %v796_v13 = vsel %vm794_vm1, %v585_v52, %v1291_v50  ;;  %v586_v55 = vsel %vm584_vm3, %v585_v52, %v1291_v50  ;;  %vm681_vm1 = vweird.f32 %v1467_v5  ;;  %v1273_v5 = vld [vmem:[%s1571_s9 + $0x10] sm:$0xff]  }
 0x372   :  { %v793_v57 = vsel %vm791_vm5, %v1289_v49, %v582_v54  ;;  %v583_v59 = vsel %vm581_vm6, %v1289_v49, %v582_v54 }
 0x373   :  { %v797_v60 = vsel %vm790_vm7, %v793_v57, %v796_v13  ;;  %v587_v63 = vsel %vm580_vm8, %v583_v59, %v586_v55 }
 0x374   :  { %v798_v3 = vsel %vm578_vm9, nan, %v797_v60  ;;  %v588_v56 = vsel %vm578_vm9, nan, %v587_v63 }
 0x375   :  { %v903_v4 = vmul.f32 %v798_v3, %v418_v51  ;;  %v692_v6 = vmul.f32 %v588_v56, %v418_v51 }
 0x378   :  { %v1293_v9 = vpop.eup %1292 }
 0x379   :  { %v1295_v10 = vpop.eup %1294  ;;  %v688_v11 = vxor.u32 2147483648, %v1293_v9 }
 0x37a   :  { %v685_v14 = vxor.u32 2147483648, %v1295_v10 }
 0x37b   :  { %v900_v15 = vsel %vm898_vm10, %v688_v11, %v1295_v10  ;;  %v689_v16 = vsel %vm687_vm11, %v688_v11, %v1295_v10 }
 0x37c   :  { %v897_v62 = vsel %vm895_vm12, %v1293_v9, %v685_v14  ;;  %v686_v17 = vsel %vm684_vm13, %v1293_v9, %v685_v14 }
 0x37d   :  { %v901_v21 = vsel %vm894_vm14, %v897_v62, %v900_v15  ;;  %v690_v22 = vsel %vm683_vm15, %v686_v17, %v689_v16 }
 0x37e   :  { %v902_v23 = vsel %vm681_vm1, nan, %v901_v21  ;;  %v691_v25 = vsel %vm681_vm1, nan, %v690_v22 }
 0x37f   :  { %v904_v27 = vmul.f32 %v902_v23, %v421_v19  ;;  %v693_v18 = vmul.f32 %v691_v25, %v421_v19 }
 0x381   :  { %v905_v1 = vpack.c.bf16 %v904_v27, %v903_v4  ;;  %v694_v2 = vpack.c.bf16 %v693_v18, %v692_v6 }
 0x383   :  { %1211 = vmatpush3.bf16.msra.mxu0 %v905_v1  ;;  %1217 = vmatpush3.bf16.msra.mxu1 %v694_v2 }
 0x384   :  { %1222 = vmatprep.subr.bf16.mxu0 %v1298_v36 }
 0x386   :  { %1213 = vmatmul.mubr.msk.bf16.vlgmr.msra.gmra.mxu0 %vm89_vm0, %v1270_v29  ;;  %1219 = vmatmul.mubr.msk.bf16.vlgmr.msra.gmra.mxu1 %vm89_vm0, %v1271_v24  ;;  %vm1048_vm0 = vcmask 523264  }
 0x387   :  { %1223 = vmatpush3.bf16.msra.mxu0 %v1272_v58  ;;  %1230 = vmatprep.mubr.msk.bf16.mxu0 %vm1299_vm4, %v1298_v36 }
 0x388   :  { %1224 = vmatprep.subr.bf16.mxu0 %v1298_v36 }
 0x38b   :  { %1225 = vmatpush3.bf16.msra.mxu0 %v1273_v5 }
 0x38c   :  { %1226 = vmatprep.subr.bf16.mxu0 %v1298_v36 }
 0x38f   :  { %1227 = vmatpush3.bf16.msra.mxu0 %v1274_v26 }
 0x390   :  { %1228 = vmatprep.subr.bf16.mxu0 %v1298_v36  ;;  %v1146_v36 = vld [vmem:[%s1572_s10] ss:$0 sm:$0xff] }
 0x393   :  { %1229 = vmatpush3.bf16.msra.mxu0 %v1275_v28 }
 0x446   :  { %v952_v31 = vpop.f32.mrf.mxu0  ;;  %v1001_v32 = vpop.f32.mrf.mxu1 }
 0x447   :  { %v1002_v37 = vadd.f32 %v1001_v32, %v952_v31 }
 0x448   :  { %v1214_v33 = vpop.f32.mrf.mxu0  ;;  %v1220_v34 = vpop.f32.mrf.mxu1 }
 0x44a   :  { %v955_v35 = vpop.f32.mrf.mxu0  ;;  %v1004_v30 = vpop.f32.mrf.mxu1 }
 0x44b   :  { %v1005_v39 = vadd.f32 %v1004_v30, %v955_v35 }
 0x44c   :  { %v1215_v38 = vpop.f32.mrf.mxu0  ;;  %v1221_v40 = vpop.f32.mrf.mxu1 }
 0x44d   :  { %v1008_v41 = vpack.c.bf16 %v1005_v39, %v1002_v37 }
 0x44f   :  { %1231 = vmatmul.mubr.msk.bf16.vlgmr.msra.gmra.mxu0 %vm1048_vm0, %v1008_v41 }
 0x50f   :  { %v1086_v43 = vpop.f32.mrf.mxu0 }
 0x510   :  { %v1087_v44 = vadd.f32 %v1146_v36, %v1086_v43 }
 0x511   :  { %v1232_v45 = vpop.f32.mrf.mxu0 }
 0x512   :  { %1093 = vst.msk [vmem:[%s1573_s11] sm:$0xff] %vm207_vm2, %v1087_v44 }
 0x513   :  { %v1089_v0 = vpop.f32.mrf.mxu0 }
 0x514   :  { %v1090_v46 = vadd.f32 %v1146_v36, %v1089_v0 }
 0x515   :  { %v1233_v47 = vpop.f32.mrf.mxu0 }
 0x516   :  { %1094 = vst.msk [vmem:[%s1573_s11 + $0x8] sm:$0xff] %vm207_vm2, %v1090_v46 }

</bundles_post_ra>
